<compile_context>
chip_gen: v7x
topology: tpu7x:2x2x1
jax: 0.10.0
libtpu: 0.0.40
codegen_flags: <defaults>
</compile_context>

<pallas_src>
import numpy as np
import jax
import jax.numpy as jnp
from jax.experimental import pallas as pl
from jax.experimental.pallas import tpu as pltpu

IOU_TH = 0.4
SENTINEL = 1.0e4   # padded-target center (far away, zero-size box -> IoU == 0)


# ---------------------------------------------------------------------------
# Pallas kernel: EDLoss matrix, IoU matrix, per-src max IoU (one grid step = one image)
# ---------------------------------------------------------------------------
def _match_kernel(src_pc_ref, src_bb_ref, tgt_t_ref, ed_ref, iou_ref, ms_ref):
    src_pc = src_pc_ref[...]        # (S_pad, 2)   [xc, yc]
    src_bb = src_bb_ref[...]        # (S_pad, 4)   [xc, yc, w, h]
    tgt_t = tgt_t_ref[...]          # (4, T_pad)   rows = xc, yc, w, h

    # --- Euclidean distance (EuDst) ----------------------------------------
    sxc = src_pc[:, 0:1]            # (S_pad, 1)
    syc = src_pc[:, 1:2]            # (S_pad, 1)
    txc = tgt_t[0:1, :]             # (1, T_pad)
    tyc = tgt_t[1:2, :]             # (1, T_pad)
    # NOTE: keep sqrt — Hungarian minimizes a SUM; sqrt is not sum-monotone, so
    # using squared distance could change the assignment.
    ed_ref[...] = jnp.sqrt((sxc - txc) ** 2 + (syc - tyc) ** 2)

    # --- bbox xcycwh -> xyxy (both sides) -----------------------------------
    bxc = src_bb[:, 0:1]
    byc = src_bb[:, 1:2]
    bw = src_bb[:, 2:3]
    bh = src_bb[:, 3:4]
    sx1 = bxc - 0.5 * bw
    sy1 = byc - 0.5 * bh
    sx2 = bxc + 0.5 * bw
    sy2 = byc + 0.5 * bh

    tw = tgt_t[2:3, :]
    th = tgt_t[3:4, :]
    tx1 = txc - 0.5 * tw
    ty1 = tyc - 0.5 * th
    tx2 = txc + 0.5 * tw
    ty2 = tyc + 0.5 * th

    # --- pairwise IoU (box_iou) ----------------------------------------------
    iw = jnp.maximum(jnp.minimum(sx2, tx2) - jnp.maximum(sx1, tx1), 0.0)   # (S_pad, T_pad)
    ih = jnp.maximum(jnp.minimum(sy2, ty2) - jnp.maximum(sy1, ty1), 0.0)   # (S_pad, T_pad)
    inter = iw * ih
    area_s = (sx2 - sx1) * (sy2 - sy1)                                     # (S_pad, 1)
    area_t = (tx2 - tx1) * (ty2 - ty1)                                     # (1, T_pad)
    union = area_s + area_t - inter
    # divide on the EUP slot (approx reciprocal) + guard against 0/0 for degenerate boxes
    iou = inter * pl.reciprocal(jnp.maximum(union, 1e-9), approx=True)
    iou_ref[...] = iou

    # --- per-src max IoU (torch.max(iou, dim=1)) ------------------------------
    ms_ref[...] = jnp.max(iou, axis=1, keepdims=True)                      # (S_pad, 1)


def match_batched(src_pc_b, src_bb_b, tgt_t_b):
    """One pallas_call for the whole padded batch.

    src_pc_b : (B, S_pad, 2) f32
    src_bb_b : (B, S_pad, 4) f32
    tgt_t_b  : (B, 4, T_pad) f32   (targets transposed, padded with sentinel boxes)
    Returns  : EDLoss (B,S_pad,T_pad), IoU (B,S_pad,T_pad), max IoU (B,S_pad,1)
    """
    B, S_pad, _ = src_pc_b.shape
    T_pad = tgt_t_b.shape[-1]

    out_shapes = (
        jax.ShapeDtypeStruct((B, S_pad, T_pad), jnp.float32),   # EDLoss
        jax.ShapeDtypeStruct((B, S_pad, T_pad), jnp.float32),   # IoU
        jax.ShapeDtypeStruct((B, S_pad, 1), jnp.float32),       # max IoU per src
    )
    return pl.pallas_call(
        _match_kernel,
        out_shape=out_shapes,
        grid=(B,),
        in_specs=[
            pl.BlockSpec((None, S_pad, 2), lambda b: (b, 0, 0)),
            pl.BlockSpec((None, S_pad, 4), lambda b: (b, 0, 0)),
            pl.BlockSpec((None, 4, T_pad), lambda b: (b, 0, 0)),
        ],
        out_specs=(
            pl.BlockSpec((None, S_pad, T_pad), lambda b: (b, 0, 0)),
            pl.BlockSpec((None, S_pad, T_pad), lambda b: (b, 0, 0)),
            pl.BlockSpec((None, S_pad, 1), lambda b: (b, 0, 0)),
        ),
        compiler_params=pltpu.CompilerParams(
            dimension_semantics=("parallel",)),
    )(src_pc_b, src_bb_b, tgt_t_b)


# ---------------------------------------------------------------------------
# Host-side Hungarian assignment (scipy.optimize.linear_sum_assignment semantics)
# TODO(synk): combinatorial assignment has no clean Pallas equivalent; it runs on the
#             host over the tiny (S, T) cost matrix produced by the kernel.
# ---------------------------------------------------------------------------
def linear_sum_assignment_np(cost):
    """O(n^3) Hungarian algorithm (potentials / Jonker-Volgenant style), pure numpy."""
    cost = np.asarray(cost, dtype=np.float64)
    n_r, n_c = cost.shape
    if n_r == 0 or n_c == 0:
        return np.zeros((0,), np.int64), np.zeros((0,), np.int64)
    transposed = n_r > n_c
    a = cost.T if transposed else cost
    n, m = a.shape                         # n <= m

    u = np.zeros(n + 1)
    v = np.zeros(m + 1)
    p = np.zeros(m + 1, dtype=np.int64)    # p[j] = row (1-based) matched to column j
    way = np.zeros(m + 1, dtype=np.int64)

    for i in range(1, n + 1):
        p[0] = i
        j0 = 0
        minv = np.full(m + 1, np.inf)
        used = np.zeros(m + 1, dtype=bool)
        while True:
            used[j0] = True
            i0 = p[j0]
            delta = np.inf
            j1 = 0
            for j in range(1, m + 1):
                if not used[j]:
                    cur = a[i0 - 1, j - 1] - u[i0] - v[j]
                    if cur < minv[j]:
                        minv[j] = cur
                        way[j] = j0
                    if minv[j] < delta:
                        delta = minv[j]
                        j1 = j
            for j in range(m + 1):
                if used[j]:
                    u[p[j]] += delta
                    v[j] -= delta
                else:
                    minv[j] -= delta
            j0 = j1
            if p[j0] == 0:
                break
        while j0 != 0:
            j1 = way[j0]
            p[j0] = p[j1]
            j0 = j1

    col_of_row = np.zeros(n, dtype=np.int64)
    for j in range(1, m + 1):
        if p[j] != 0:
            col_of_row[p[j] - 1] = j - 1

    if not transposed:
        return np.arange(n, dtype=np.int64), col_of_row
    # solved on the transpose: "rows" there are the original columns
    pairs = sorted((int(col_of_row[i]), i) for i in range(n))
    row_ind = np.array([r for r, _ in pairs], dtype=np.int64)
    col_ind = np.array([c for _, c in pairs], dtype=np.int64)
    return row_ind, col_ind


# ---------------------------------------------------------------------------
# forward() equivalent
# ---------------------------------------------------------------------------
def _round_up(x, m):
    return ((x + m - 1) // m) * m


def hungarian_match_forward(src, tgt, iou_th=IOU_TH):
    assert len(src) == len(tgt)
    N = len(src)
    matchness, iou_ls, match_idx = [], [], []
    if N == 0:
        return matchness, iou_ls, match_idx

    S_list = [int(s['proposal_center'].shape[0]) for s in src]
    T_list = [int(t['bbox'].shape[0]) for t in tgt]
    S_pad = max(8, _round_up(max(S_list), 8))
    T_pad = max(128, _round_up(max(max(T_list), 1), 128))

    # --- build one padded batch (device-side, no per-element blocking syncs) ----
    src_pc_b, src_bb_b, tgt_t_rows = [], [], []
    for b in range(N):
        pc = jnp.asarray(src[b]['proposal_center']).astype(jnp.float32).reshape(-1, 2)
        bb = jnp.asarray(src[b]['bbox']).astype(jnp.float32).reshape(-1, 4)
        src_pc_b.append(jnp.pad(pc, ((0, S_pad - S_list[b]), (0, 0))))
        src_bb_b.append(jnp.pad(bb, ((0, S_pad - S_list[b]), (0, 0))))

        tb = jnp.asarray(tgt[b]['bbox']).astype(jnp.float32).reshape(-1, 4)
        pad_rows = T_pad - T_list[b]
        pad_box = jnp.concatenate(
            [jnp.full((pad_rows, 2), SENTINEL, jnp.float32),
             jnp.zeros((pad_rows, 2), jnp.float32)], axis=1)
        tgt_t_rows.append(jnp.concatenate([tb, pad_box], axis=0))
    src_pc_b = jnp.stack(src_pc_b)                               # (B, S_pad, 2)
    src_bb_b = jnp.stack(src_bb_b)                               # (B, S_pad, 4)
    tgt_t_b = jnp.transpose(jnp.stack(tgt_t_rows), (0, 2, 1))    # (B, 4, T_pad)

    # --- single kernel launch for the whole batch -------------------------------
    ed_b, iou_b, ms_b = match_batched(src_pc_b, src_bb_b, tgt_t_b)
    # --- single bulk device->host transfer ---------------------------------------
    ed_np, iou_np, ms_np = jax.device_get((ed_b, iou_b, ms_b))

    for b in range(N):
        S = S_list[b]
        T = T_list[b]
        if T == 0:
            OJ_mask = jnp.zeros((S,), dtype=bool)
            match_idx.append({'OJ_mask': OJ_mask, 'src_idx': None,
                              'tgt_idx': None, 'nonOJ_all': True})
            continue

        ed = ed_np[b, :S, :T]
        iou = iou_np[b, :S, :T]
        max_score = ms_np[b, :S, 0]

        row, col = linear_sum_assignment_np(ed)

        OJ_mask = max_score > iou_th
        OJ_mask[row] = True

        matched = iou[row, col] > iou_th
        matchness.append(jnp.asarray(matched.sum() / max(len(matched), 1),
                                     dtype=jnp.float32))
        iou_ls.append(jnp.asarray(iou))
        match_idx.append({'OJ_mask': jnp.asarray(OJ_mask),
                          'src_idx': jnp.asarray(row),
                          'tgt_idx': jnp.asarray(col),
                          'nonOJ_all': False})
    return matchness, iou_ls, match_idx


# ---------------------------------------------------------------------------
# Demo
# ---------------------------------------------------------------------------
def _make_boxes(key, n):
    kc, ks = jax.random.split(key)
    centers = jax.random.uniform(kc, (n, 2), minval=0.2, maxval=0.8)
    sizes = jax.random.uniform(ks, (n, 2), minval=0.05, maxval=0.3)
    return jnp.concatenate([centers, sizes], axis=-1).astype(jnp.float32)


if __name__ == "__main__":
    key = jax.random.PRNGKey(0)
    ks = jax.random.split(key, 8)

    S = 8                      # src proposals per image
    Ts = [4, 3]                # tgt defects per image

    src, tgt = [], []
    for b, T in enumerate(Ts):
        src_bbox = _make_boxes(ks[2 * b], S)
        src_pc = src_bbox[:, :2] + 0.01 * jax.random.normal(ks[2 * b + 1], (S, 2))
        tgt_bbox = _make_boxes(ks[4 + b], T)
        tgt_cat = jax.random.randint(ks[6 + b % 2], (T,), 0, 6)
        src.append({'proposal_center': src_pc.astype(jnp.float32),
                    'bbox': src_bbox,
                    'category': jax.nn.softmax(jax.random.normal(ks[6], (S, 6)), axis=-1)})
        tgt.append({'bbox': tgt_bbox, 'category': tgt_cat})

    matchness, iou_ls, match_idx = hungarian_match_forward(src, tgt)

    for m in matchness:
        jax.block_until_ready(m)
    for iou in iou_ls:
        jax.block_until_ready(iou)
    for d in match_idx:
        jax.block_until_ready(d['OJ_mask'])

    print("KERNEL_OK")
</pallas_src>

<mosaic_0001>
module attributes {stable_mosaic.version = 11 : i64} {
  func.func @_match_kernel(%arg0: i32, %arg1: memref<1x8x2xf32, #tpu.memory_space<vmem>>, %arg2: memref<1x8x4xf32, #tpu.memory_space<vmem>>, %arg3: memref<1x4x128xf32, #tpu.memory_space<vmem>>, %arg4: memref<1x8x128xf32, #tpu.memory_space<vmem>>, %arg5: memref<1x8x128xf32, #tpu.memory_space<vmem>>, %arg6: memref<1x8x1xf32, #tpu.memory_space<vmem>>) attributes {dimension_semantics = [#tpu.dimension_semantics<parallel>], iteration_bounds = array<i64: 2>, scalar_prefetch = 0 : i64, scratch_operands = 0 : i64, tpu.core_type = #tpu.core_type<tc>, window_params = [{transform_indices = @transform_0, window_bounds = array<i64: 1, 8, 2>}, {transform_indices = @transform_1, window_bounds = array<i64: 1, 8, 4>}, {transform_indices = @transform_2, window_bounds = array<i64: 1, 4, 128>}, {transform_indices = @transform_3, window_bounds = array<i64: 1, 8, 128>}, {transform_indices = @transform_4, window_bounds = array<i64: 1, 8, 128>}, {transform_indices = @transform_5, window_bounds = array<i64: 1, 8, 1>}]} {
    %c0 = arith.constant 0 : index
    %c0_0 = arith.constant 0 : index
    %c0_1 = arith.constant 0 : index
    %0 = vector.load %arg1[%c0, %c0_0, %c0_1] : memref<1x8x2xf32, #tpu.memory_space<vmem>>, vector<1x8x2xf32>
    %1 = vector.shape_cast %0 : vector<1x8x2xf32> to vector<8x2xf32>
    %c0_2 = arith.constant 0 : index
    %c0_3 = arith.constant 0 : index
    %c0_4 = arith.constant 0 : index
    %2 = vector.load %arg2[%c0_2, %c0_3, %c0_4] : memref<1x8x4xf32, #tpu.memory_space<vmem>>, vector<1x8x4xf32>
    %3 = vector.shape_cast %2 : vector<1x8x4xf32> to vector<8x4xf32>
    %c0_5 = arith.constant 0 : index
    %c0_6 = arith.constant 0 : index
    %c0_7 = arith.constant 0 : index
    %4 = vector.load %arg3[%c0_5, %c0_6, %c0_7] : memref<1x4x128xf32, #tpu.memory_space<vmem>>, vector<1x4x128xf32>
    %5 = vector.shape_cast %4 : vector<1x4x128xf32> to vector<4x128xf32>
    %6 = vector.extract_strided_slice %1 {offsets = [0, 0], sizes = [8, 1], strides = [1, 1]} : vector<8x2xf32> to vector<8x1xf32>
    %7 = vector.extract_strided_slice %1 {offsets = [0, 1], sizes = [8, 1], strides = [1, 1]} : vector<8x2xf32> to vector<8x1xf32>
    %8 = vector.extract_strided_slice %5 {offsets = [0, 0], sizes = [1, 128], strides = [1, 1]} : vector<4x128xf32> to vector<1x128xf32>
    %9 = vector.extract_strided_slice %5 {offsets = [1, 0], sizes = [1, 128], strides = [1, 1]} : vector<4x128xf32> to vector<1x128xf32>
    %10 = vector.broadcast %6 : vector<8x1xf32> to vector<8x128xf32>
    %11 = vector.broadcast %8 : vector<1x128xf32> to vector<8x128xf32>
    %12 = arith.subf %10, %11 : vector<8x128xf32>
    %13 = arith.mulf %12, %12 : vector<8x128xf32>
    %14 = vector.broadcast %7 : vector<8x1xf32> to vector<8x128xf32>
    %15 = vector.broadcast %9 : vector<1x128xf32> to vector<8x128xf32>
    %16 = arith.subf %14, %15 : vector<8x128xf32>
    %17 = arith.mulf %16, %16 : vector<8x128xf32>
    %18 = arith.addf %13, %17 : vector<8x128xf32>
    %19 = math.sqrt %18 : vector<8x128xf32>
    %c0_8 = arith.constant 0 : index
    %c0_9 = arith.constant 0 : index
    %c0_10 = arith.constant 0 : index
    %20 = vector.load %arg4[%c0_8, %c0_9, %c0_10] : memref<1x8x128xf32, #tpu.memory_space<vmem>>, vector<1x8x128xf32>
    %21 = vector.shape_cast %20 : vector<1x8x128xf32> to vector<8x128xf32>
    %22 = vector.shape_cast %19 : vector<8x128xf32> to vector<1x8x128xf32>
    tpu.vector_store %arg4[%c0_8, %c0_9, %c0_10], %22 {strides = array<i32>} : memref<1x8x128xf32, #tpu.memory_space<vmem>>, vector<1x8x128xf32>,
    %23 = vector.extract_strided_slice %3 {offsets = [0, 0], sizes = [8, 1], strides = [1, 1]} : vector<8x4xf32> to vector<8x1xf32>
    %24 = vector.extract_strided_slice %3 {offsets = [0, 1], sizes = [8, 1], strides = [1, 1]} : vector<8x4xf32> to vector<8x1xf32>
    %25 = vector.extract_strided_slice %3 {offsets = [0, 2], sizes = [8, 1], strides = [1, 1]} : vector<8x4xf32> to vector<8x1xf32>
    %26 = vector.extract_strided_slice %3 {offsets = [0, 3], sizes = [8, 1], strides = [1, 1]} : vector<8x4xf32> to vector<8x1xf32>
    %cst = arith.constant 5.000000e-01 : f32
    %27 = vector.broadcast %cst : f32 to vector<8x1xf32>
    %28 = arith.mulf %27, %25 : vector<8x1xf32>
    %29 = arith.subf %23, %28 : vector<8x1xf32>
    %cst_11 = arith.constant 5.000000e-01 : f32
    %30 = vector.broadcast %cst_11 : f32 to vector<8x1xf32>
    %31 = arith.mulf %30, %26 : vector<8x1xf32>
    %32 = arith.subf %24, %31 : vector<8x1xf32>
    %cst_12 = arith.constant 5.000000e-01 : f32
    %33 = vector.broadcast %cst_12 : f32 to vector<8x1xf32>
    %34 = arith.mulf %33, %25 : vector<8x1xf32>
    %35 = arith.addf %23, %34 : vector<8x1xf32>
    %cst_13 = arith.constant 5.000000e-01 : f32
    %36 = vector.broadcast %cst_13 : f32 to vector<8x1xf32>
    %37 = arith.mulf %36, %26 : vector<8x1xf32>
    %38 = arith.addf %24, %37 : vector<8x1xf32>
    %39 = vector.extract_strided_slice %5 {offsets = [2, 0], sizes = [1, 128], strides = [1, 1]} : vector<4x128xf32> to vector<1x128xf32>
    %40 = vector.extract_strided_slice %5 {offsets = [3, 0], sizes = [1, 128], strides = [1, 1]} : vector<4x128xf32> to vector<1x128xf32>
    %cst_14 = arith.constant 5.000000e-01 : f32
    %41 = vector.broadcast %cst_14 : f32 to vector<1x128xf32>
    %42 = arith.mulf %41, %39 : vector<1x128xf32>
    %43 = arith.subf %8, %42 : vector<1x128xf32>
    %cst_15 = arith.constant 5.000000e-01 : f32
    %44 = vector.broadcast %cst_15 : f32 to vector<1x128xf32>
    %45 = arith.mulf %44, %40 : vector<1x128xf32>
    %46 = arith.subf %9, %45 : vector<1x128xf32>
    %cst_16 = arith.constant 5.000000e-01 : f32
    %47 = vector.broadcast %cst_16 : f32 to vector<1x128xf32>
    %48 = arith.mulf %47, %39 : vector<1x128xf32>
    %49 = arith.addf %8, %48 : vector<1x128xf32>
    %cst_17 = arith.constant 5.000000e-01 : f32
    %50 = vector.broadcast %cst_17 : f32 to vector<1x128xf32>
    %51 = arith.mulf %50, %40 : vector<1x128xf32>
    %52 = arith.addf %9, %51 : vector<1x128xf32>
    %53 = vector.broadcast %35 : vector<8x1xf32> to vector<8x128xf32>
    %54 = vector.broadcast %49 : vector<1x128xf32> to vector<8x128xf32>
    %55 = arith.minimumf %53, %54 : vector<8x128xf32>
    %56 = vector.broadcast %29 : vector<8x1xf32> to vector<8x128xf32>
    %57 = vector.broadcast %43 : vector<1x128xf32> to vector<8x128xf32>
    %58 = arith.maximumf %56, %57 : vector<8x128xf32>
    %59 = arith.subf %55, %58 : vector<8x128xf32>
    %cst_18 = arith.constant 0.000000e+00 : f32
    %60 = vector.broadcast %cst_18 : f32 to vector<8x128xf32>
    %61 = arith.maximumf %59, %60 : vector<8x128xf32>
    %62 = vector.broadcast %38 : vector<8x1xf32> to vector<8x128xf32>
    %63 = vector.broadcast %52 : vector<1x128xf32> to vector<8x128xf32>
    %64 = arith.minimumf %62, %63 : vector<8x128xf32>
    %65 = vector.broadcast %32 : vector<8x1xf32> to vector<8x128xf32>
    %66 = vector.broadcast %46 : vector<1x128xf32> to vector<8x128xf32>
    %67 = arith.maximumf %65, %66 : vector<8x128xf32>
    %68 = arith.subf %64, %67 : vector<8x128xf32>
    %cst_19 = arith.constant 0.000000e+00 : f32
    %69 = vector.broadcast %cst_19 : f32 to vector<8x128xf32>
    %70 = arith.maximumf %68, %69 : vector<8x128xf32>
    %71 = arith.mulf %61, %70 : vector<8x128xf32>
    %72 = arith.subf %35, %29 : vector<8x1xf32>
    %73 = arith.subf %38, %32 : vector<8x1xf32>
    %74 = arith.mulf %72, %73 : vector<8x1xf32>
    %75 = arith.subf %49, %43 : vector<1x128xf32>
    %76 = arith.subf %52, %46 : vector<1x128xf32>
    %77 = arith.mulf %75, %76 : vector<1x128xf32>
    %78 = vector.broadcast %74 : vector<8x1xf32> to vector<8x128xf32>
    %79 = vector.broadcast %77 : vector<1x128xf32> to vector<8x128xf32>
    %80 = arith.addf %78, %79 : vector<8x128xf32>
    %81 = arith.subf %80, %71 : vector<8x128xf32>
    %cst_20 = arith.constant 9.99999971E-10 : f32
    %82 = vector.broadcast %cst_20 : f32 to vector<8x128xf32>
    %83 = arith.maximumf %81, %82 : vector<8x128xf32>
    %84 = tpu.reciprocal %83 {approx = true} : vector<8x128xf32> -> vector<8x128xf32>
    %85 = arith.mulf %71, %84 : vector<8x128xf32>
    %c0_21 = arith.constant 0 : index
    %c0_22 = arith.constant 0 : index
    %c0_23 = arith.constant 0 : index
    %86 = vector.load %arg5[%c0_21, %c0_22, %c0_23] : memref<1x8x128xf32, #tpu.memory_space<vmem>>, vector<1x8x128xf32>
    %87 = vector.shape_cast %86 : vector<1x8x128xf32> to vector<8x128xf32>
    %88 = vector.shape_cast %85 : vector<8x128xf32> to vector<1x8x128xf32>
    tpu.vector_store %arg5[%c0_21, %c0_22, %c0_23], %88 {strides = array<i32>} : memref<1x8x128xf32, #tpu.memory_space<vmem>>, vector<1x8x128xf32>,
    %cst_24 = arith.constant dense<0xFF800000> : vector<8xf32>
    %89 = vector.multi_reduction <maximumf>, %85, %cst_24 [1] : vector<8x128xf32> to vector<8xf32>
    %90 = vector.shape_cast %89 : vector<8xf32> to vector<8x1xf32>
    %c0_25 = arith.constant 0 : index
    %c0_26 = arith.constant 0 : index
    %c0_27 = arith.constant 0 : index
    %91 = vector.load %arg6[%c0_25, %c0_26, %c0_27] : memref<1x8x1xf32, #tpu.memory_space<vmem>>, vector<1x8x1xf32>
    %92 = vector.shape_cast %91 : vector<1x8x1xf32> to vector<8x1xf32>
    %93 = vector.shape_cast %90 : vector<8x1xf32> to vector<1x8x1xf32>
    tpu.vector_store %arg6[%c0_25, %c0_26, %c0_27], %93 {strides = array<i32>} : memref<1x8x1xf32, #tpu.memory_space<vmem>>, vector<1x8x1xf32>,
    return
  }
  func.func @transform_0(%arg0: i32) -> (i32, i32, i32) {
    %c0_i32 = arith.constant 0 : i32
    %c0_i32_0 = arith.constant 0 : i32
    %c0_i32_1 = arith.constant 0 : i32
    return %arg0, %c0_i32, %c0_i32_0 : i32, i32, i32
  }
  func.func @transform_1(%arg0: i32) -> (i32, i32, i32) {
    %c0_i32 = arith.constant 0 : i32
    %c0_i32_0 = arith.constant 0 : i32
    %c0_i32_1 = arith.constant 0 : i32
    return %arg0, %c0_i32, %c0_i32_0 : i32, i32, i32
  }
  func.func @transform_2(%arg0: i32) -> (i32, i32, i32) {
    %c0_i32 = arith.constant 0 : i32
    %c0_i32_0 = arith.constant 0 : i32
    %c0_i32_1 = arith.constant 0 : i32
    return %arg0, %c0_i32, %c0_i32_0 : i32, i32, i32
  }
  func.func @transform_3(%arg0: i32) -> (i32, i32, i32) {
    %c0_i32 = arith.constant 0 : i32
    %c0_i32_0 = arith.constant 0 : i32
    %c0_i32_1 = arith.constant 0 : i32
    return %arg0, %c0_i32, %c0_i32_0 : i32, i32, i32
  }
  func.func @transform_4(%arg0: i32) -> (i32, i32, i32) {
    %c0_i32 = arith.constant 0 : i32
    %c0_i32_0 = arith.constant 0 : i32
    %c0_i32_1 = arith.constant 0 : i32
    return %arg0, %c0_i32, %c0_i32_0 : i32, i32, i32
  }
  func.func @transform_5(%arg0: i32) -> (i32, i32, i32) {
    %c0_i32 = arith.constant 0 : i32
    %c0_i32_0 = arith.constant 0 : i32
    %c0_i32_1 = arith.constant 0 : i32
    return %arg0, %c0_i32, %c0_i32_0 : i32, i32, i32
  }
}

</mosaic_0001>

<bundles_post_ra>
// kernel: tpu_custom_call.1
= control target key start
LH: loop header
LB: loop body
LE: loop exit
PB: predicated region body
PF: predicated region fallthrough
CT: control target
= control target key end

     0   :  { %11 = vsyncpa [#allocation3], 0  ;;  %s925_s0 = inlined_call_operand.vmem [shape: f32[2,8,2], index: 0, kind: input, shape index: {}]   ;;  %s926_s1 = inlined_call_operand.vmem [shape: f32[2,8,4], index: 1, kind: input, shape index: {}]   ;;  %s927_s2 = inlined_call_operand.vmem [shape: f32[2,4,128], index: 2, kind: input, shape index: {}]   ;;  %s928_s3 = inlined_call_operand.hbm [shape: f32[2,8,128], index: 3, kind: output, shape index: {0}]   ;;  %s929_s4 = inlined_call_operand.hbm [shape: f32[2,8,128], index: 4, kind: output, shape index: {1}]   ;;  %s930_s5 = inlined_call_operand.vmem [shape: f32[2,8,1], index: 5, kind: output, shape index: {2}]  }
   0x1   :  { %13 = vsyncpa [#allocation3 + $0x1], 0 }
   0x2   :  { %14 = vsyncpa [#allocation5], 0 }
   0x3   :  { %16 = vsyncpa [#allocation5 + $0x1], 0  ;;  %s778_s18 = smov 0   ;;  %s780_s19 = smov 0  }
   0x4   :  { %s782_s20 = smov 0   ;;  %s784_s21 = smov 0  }
   0x5 LB: > { %s799_s22 = sadd.s32 4294967295, %s740_s21   ;;  %s572_s23 = sadd.s32 4294967294, %s740_s21   ;;  %s740_s21 = sphi %s784_s21, %s936_s21   ;;  %s736_s20 = sphi %s782_s20, %s935_s20   ;;  %s732_s19 = sphi %s780_s19, %s934_s19   ;;  %s728_s18 = sphi %s778_s18, %s933_s18  }
   0x6   : > { %s803_s24 = sadd.s32 1, %s740_s21   ;;  %s107_s25 = sadd.s32 1, %s736_s20 }
   0x7   : > { %s104_s26 = ssub.s32 %s740_s21, %s803_s24  ;;  %p117_p0 = scmp.ne.s32.totalorder %s736_s20, %s732_s19 }
   0x8   : > { %p105_p1 = scmp.eq.s32.totalorder %s104_s26, 0  ;;  %p118_p2 = scmp.eq.s32.totalorder %s799_s22, 1 }
   0x9   : > { %p123_p3 = scmp.ne.s32.totalorder %s732_s19, %s728_s18  ;;  %p124_p4 = scmp.eq.s32.totalorder %s572_s23, 1 }
   0xa   : > { %s814_s27 = scalar_select %p105_p1, %s736_s20, %s107_s25  }
   0xb   : > { %p816_p5 = por %p118_p2, %p117_p0  ;;  %p820_p6 = por %p124_p4, %p123_p3 }
   0xc   : > { %p575_p7 = scmp.ge.s32.totalorder %s740_s21, 1  ;;  %p215_p8 = scmp.lt.s32.totalorder %s740_s21, 3 }
   0xe   : > { %p216_p9 = pnand %p575_p7, %p215_p8 }
   0xf   : > { %p259_p10 = scmp.lt.s32.totalorder (!%p216_p9), %s799_s22, 1  ;;  %v742_v0 = vmov (!%p216_p9), 0   ;;  %v743_v1 = vmov (!%p216_p9), 1   ;;  %s744_s10 = smov (!%p216_p9), 126   ;;  %v283_v14 = vlaneseq (!%p216_p9) }
  0x10   : > { %219 = sbr.rel (%p216_p9) target bundleno = 556 (0x22c), region = 32  ;;  %636 = vset.pattern.permute.xlu1 (!%p216_p9), %v742_v0  ;;  %637 = vset.pattern.permute.xlu0 (!%p216_p9), %v743_v1  ;;  %s745_s11 = smov (!%p216_p9), 127  }
  0x11   : > { %v284_v17 = vshrl.u32 (!%p216_p9), %v283_v14, 7  ;;  %s846_s25 = sand.u32 (!%p216_p9), 1, %s732_s19   ;;  %s584_s8 = sshll.u32 (!%p216_p9), %s799_s22, 7 }
  0x12   : > { %s576_s26 = sshll.u32 (!%p216_p9), %s846_s25, 3  ;;  %s858_s12 = scalar_lea.hbm (!%p216_p9), %s928_s3, %s584_s8 }
  0x13   : > { %v295_v20 = vsub.s32 (!%p216_p9), 1, %v284_v17  ;;  %v285_v21 = vsub.s32 (!%p216_p9), 0, %v284_v17  ;;  %s245_s7 = scalar_lea.vmem (!%p216_p9), [#allocation2], %s576_s26  ;;  %s395_s13 = scalar_lea.sflag (!%p216_p9), [#allocation3], %s846_s25 }
  0x17   : > { %s828_s30 = scalar_select %p259_p10, %s799_s22, 1 }
  0x19   : > { %s831_s6 = sshll.u32 %s828_s30, 3  ;;  %s580_s15 = sshll.u32 %s828_s30, 2 }
  0x1a   : > { %s266_s9 = scalar_lea.vmem %s926_s1, %s831_s6  ;;  %s262_s14 = scalar_lea.vmem %s925_s0, %s831_s6 }
  0x1b   : > { %v276_v2 = vld [vmem:[%s266_s9] sm:$0xff]  ;;  %s270_s23 = scalar_lea.vmem %s927_s2, %s580_s15  ;;  %s849_s30 = scalar_lea.vmem [#allocation4], %s576_s26 }
  0x1c   : > { %v308_v3 = vmul.f32 0.5, %v276_v2  ;;  %v275_v8 = vld [vmem:[%s262_s14] sm:$0xff]  ;;  %s417_s9 = sshll.u32 %s245_s7, 4  ;;  %s746_s15 = smov [#allocation2]   ;;  %s418_s9 = int_to_ptr.vmem [resolvable:$true] %s417_s9 }
  0x1d   : > { %v277_v11 = vld [vmem:[%s270_s23] sm:$0xf]  ;;  %s646_s14 = scalar_lea.vmem %s418_s9, 128  ;;  %s650_s16 = sshll.u32 %s746_s15, 4  ;;  %s651_s16 = int_to_ptr.vmem [resolvable:$false] %s650_s16 }
  0x1e   : > { %310 = vrot.lane.b32.xlu0 %v308_v3, %s744_s10  ;;  %v315_v13 = vmul.f32 0.5, %v277_v11  ;;  %v286_v39 = vrot.slane %v277_v11, %v285_v21  ;;  %v296_v45 = vrot.slane %v277_v11, %v295_v20  ;;  %p647_p11 = scmp.ne.s32.totalorder %s418_s9, %s646_s14  ;;  %s652_s17 = scalar_lea.vmem %s651_s16, 256 }
  0x1f   : > { %p653_p0 = scmp.lt.s32.totalorder %s418_s9, %s651_s16  ;;  %p654_p1 = scmp.lt.s32.totalorder %s652_s17, %s646_s14 }
  0x20   : > { %v317_v15 = vrot.slane %v315_v13, 2  ;;  %p648_p12 = pnand %p647_p11, %p816_p5 }
  0x21   : > { %p655_p2 = por %p654_p1, %p653_p0 }
  0x22   : > { %v320_v18 = vadd.f32 %v317_v15, %v277_v11  ;;  %v319_v19 = vsub.f32 %v277_v11, %v317_v15  ;;  %p649_p13 = pneg %p648_p12 }
  0x24   : > { %v359_v22 = vrot.slane %v319_v19, %v295_v20  ;;  %v370_v23 = vsub.f32 %v320_v18, %v319_v19  ;;  %v339_v25 = vrot.slane %v319_v19, %v285_v21  ;;  %v350_v26 = vrot.slane %v320_v18, %v295_v20  ;;  %p656_p3 = pnand %p655_p2, %p649_p13 }
  0x25   : > { %v329_v28 = vrot.slane %v320_v18, %v285_v21 }
  0x26   : > { %v372_v30 = vrot.slane %v370_v23, 1 }
  0x28   : > { %v374_v35 = vmul.f32 %v372_v30, %v370_v23 }
  0x2a   : > { %v383_v38 = vrot.slane %v374_v35, %v285_v21 }
  0x90   : > { %v311_v4 = vpop.permute.xlu0 %310 }
  0x91   : > { %v313_v5 = vsub.f32 %v276_v2, %v311_v4  ;;  %v314_v6 = vadd.f32 %v311_v4, %v276_v2 }
  0x93   : > { %323 = vperm.xlu1 %636, %v314_v6   ;;  %v364_v7 = vsub.f32 %v314_v6, %v313_v5 }
  0x95   : > { %366 = vrot.lane.b32.xlu0 %v364_v7, %s745_s11 }
  0x97   : > { %333 = vperm.xlu1 %636, %v313_v5  }
  0x99   : > { %344 = vperm.xlu0 %637, %v314_v6  }
  0x9b   : > { %638 = vset.pattern.permute.xlu1 %v743_v1 }
  0x9c   : > { %353 = vperm.xlu1 %638, %v313_v5  }
  0x9d   : > { %640 = vset.pattern.permute.xlu0 %v742_v0 }
  0x9e   : > { %280 = vperm.xlu0 %640, %v275_v8  }
  0xa0   : > { %639 = vset.pattern.permute.xlu1 %v742_v0 }
 0x107   : > { %v367_v9 = vpop.permute.xlu0 %366 }
 0x108   : > { %v369_v10 = vmul.f32 %v367_v9, %v364_v7 }
 0x10a   : > { %377 = vperm.xlu1 %639, %v369_v10  }
 0x10e   : > { %641 = vset.pattern.permute.xlu1 %v743_v1 }
 0x10f   : > { %290 = vperm.xlu1 %641, %v275_v8  }
 0x112   : > { %v324_v12 = vpop.permute.xlu1 %323 }
 0x113   : > { %v330_v33 = vmin.f32 %v324_v12, %v329_v28 }
 0x116   : > { %v334_v16 = vpop.permute.xlu1 %333 }
 0x117   : > { %v340_v31 = vmax.f32 %v334_v16, %v339_v25 }
 0x118   : > { %v345_v27 = vpop.permute.xlu0 %344 }
 0x119   : > { %v351_v32 = vmin.f32 %v345_v27, %v350_v26  ;;  %v341_v36 = vsub.f32 %v330_v33, %v340_v31 }
 0x11b   : > { %v354_v24 = vpop.permute.xlu1 %353  ;;  %v342_v40 = vmax.f32 %v341_v36, 0.0 }
 0x11c   : > { %v360_v29 = vmax.f32 %v354_v24, %v359_v22 }
 0x11d   : > { %v281_v41 = vpop.permute.xlu0 %280 }
 0x11e   : > { %v361_v34 = vsub.f32 %v351_v32, %v360_v29  ;;  %v287_v46 = vsub.f32 %v281_v41, %v286_v39 }
 0x120   : > { %v362_v37 = vmax.f32 %v361_v34, 0.0  ;;  %v288_v51 = vmul.f32 %v287_v46, %v287_v46 }
 0x122   : > { %v363_v43 = vmul.f32 %v362_v37, %v342_v40 }
 0x189   : > { %v378_v42 = vpop.permute.xlu1 %377 }
 0x18a   : > { %v384_v44 = vadd.f32 %v383_v38, %v378_v42 }
 0x18c   : > { %v385_v47 = vsub.f32 %v384_v44, %v363_v43 }
 0x18e   : > { %v386_v48 = vmax.f32 %v385_v47, 1e-09  ;;  %v291_v49 = vpop.permute.xlu1 %290 }
 0x18f   : > { %v297_v50 = vsub.f32 %v291_v49, %v296_v45 }
 0x190   : > { %642 = vrcp.f32 %v386_v48 }
 0x191   : > { %v298_v52 = vmul.f32 %v297_v50, %v297_v50 }
 0x193   : > { %v299_v53 = vadd.f32 %v298_v52, %v288_v51 }
 0x195   : > { %644 = vrsqrt.f32 %v299_v53  ;;  %vm302_vm0 = vcmp.eq.f32.partialorder %v299_v53, inf  ;;  %v305_v57 = vand.u32 2147483648, %v299_v53  ;;  %vm304_vm1 = vcmp.eq.f32.partialorder %v299_v53, 0.0 }
 0x19a   : > { %v643_v54 = vpop.eup %642 }
 0x19b   : > { %v388_v55 = vmul.f32 %v643_v54, %v363_v43 }
 0x19d   : > { %390 = vmax.xlane.f32.xlu1 %v388_v55  ;;  %389 = vst [vmem:[%s849_s30] sm:$0xff] %v388_v55 }
 0x19f   : > { %v645_v56 = vpop.eup %644 }
 0x1a0   : > { %v301_v58 = vmul.f32 %v645_v56, %v299_v53 }
 0x1a2   : > { %v303_v59 = vsel %vm302_vm0, %v299_v53, %v301_v58 }
 0x1a3   : > { %v306_v60 = vsel %vm304_vm1, %v305_v57, %v303_v59 }
 0x1a4   : > { %307 = vst [vmem:[%s245_s7] sm:$0xff] %v306_v60 }
 0x1a5   : > { %659 = shalt.err (!%p656_p3)
}
 0x1a6   : > { %s660_s23 = scalar_lea.hbm %s858_s12, 128  ;;  %s664_s10 = scalar_lea.hbm %s928_s3, 256 }
 0x1a7   : > { %p661_p4 = scmp.ne.s32.totalorder %s858_s12, %s660_s23  ;;  %p665_p9 = scmp.lt.u32.totalorder %s858_s12, %s928_s3 }
 0x1a8   : > { %p666_p10 = scmp.lt.u32.totalorder %s664_s10, %s660_s23  ;;  %p668_p12 = scmp.lt.u32.totalorder %s660_s23, %s858_s12 }
 0x1a9   : > { %p662_p7 = pnand %p661_p4, %p816_p5 }
 0x1aa   : > { %p667_p11 = por %p666_p10, %p665_p9 }
 0x1ab   : > { %p663_p8 = pneg %p662_p7 }
 0x1ac   : > { %p669_p13 = por %p668_p12, %p667_p11 }
 0x1ae   : > { %p670_p0 = pnand %p669_p13, %p663_p8 }
 0x1b0   : > { %673 = shalt.err (!%p670_p0)
}
 0x1b1   : > { %588 = dma.vmem_to_hbm [thread:$0]  (%p816_p5), %s418_s9, 128, %s858_s12, %s395_s13  }
 0x1b2   : > { %s883_s17 = scalar_lea.hbm %s929_s4, %s584_s8  ;;  %s430_s26 = sshll.u32 %s849_s30, 4  ;;  %s431_s26 = int_to_ptr.vmem [resolvable:$true] %s430_s26 }
 0x1b3   : > { %s400_s23 = scalar_lea.sflag [#allocation5], %s846_s25  ;;  %s674_s7 = scalar_lea.vmem %s431_s26, 128 }
 0x1b4   : > { %p675_p1 = scmp.ne.s32.totalorder %s431_s26, %s674_s7  ;;  %s747_s10 = smov [#allocation4]  }
 0x1b5   : > { %s678_s11 = sshll.u32 %s747_s10, 4  ;;  %s679_s11 = int_to_ptr.vmem [resolvable:$false] %s678_s11 }
 0x1b6   : > { %p676_p2 = pnand %p675_p1, %p816_p5  ;;  %s680_s15 = scalar_lea.vmem %s679_s11, 256 }
 0x1b7   : > { %p681_p4 = scmp.lt.s32.totalorder %s431_s26, %s679_s11  ;;  %p682_p7 = scmp.lt.s32.totalorder %s680_s15, %s674_s7 }
 0x1b8   : > { %p677_p3 = pneg %p676_p2 }
 0x1b9   : > { %p683_p8 = por %p682_p7, %p681_p4 }
 0x1bb   : > { %p684_p9 = pnand %p683_p8, %p677_p3 }
 0x1bd   : > { %687 = shalt.err (!%p684_p9)
}
 0x1be   : > { %s688_s22 = scalar_lea.hbm %s883_s17, 128  ;;  %s692_s8 = scalar_lea.hbm %s929_s4, 256 }
 0x1bf   : > { %p689_p10 = scmp.ne.s32.totalorder %s883_s17, %s688_s22  ;;  %p693_p13 = scmp.lt.u32.totalorder %s883_s17, %s929_s4 }
 0x1c0   : > { %p694_p0 = scmp.lt.u32.totalorder %s692_s8, %s688_s22  ;;  %p696_p2 = scmp.lt.u32.totalorder %s688_s22, %s883_s17 }
 0x1c1   : > { %p690_p11 = pnand %p689_p10, %p816_p5 }
 0x1c2   : > { %p695_p1 = por %p694_p0, %p693_p13 }
 0x1c3   : > { %p691_p12 = pneg %p690_p11 }
 0x1c4   : > { %p697_p3 = por %p696_p2, %p695_p1 }
 0x1c6   : > { %p698_p4 = pnand %p697_p3, %p691_p12 }
 0x1c8   : > { %701 = shalt.err (!%p698_p4)
}
 0x1c9   : > { %589 = dma.vmem_to_hbm [thread:$0]  (%p816_p5), %s431_s26, 128, %s883_s17, %s400_s23   ;;  %vm392_vm2 = vcmask 7168  }
 0x1ca   : > { %s274_s16 = scalar_lea.vmem %s930_s5, %s831_s6 }
 0x22a   : > { %v391_v61 = vpop.xlane.xlu1 %390 }
 0x22b   : > { %393 = vst.msk [vmem:[%s274_s16] sm:$0xff] %vm392_vm2, %v391_v61 }
 0x22c PF: > { %p599_p7 = scmp.ge.s32.totalorder %s740_s21, 2  ;;  %s445_s7 = sand.u32 1, %s728_s18  }
 0x22d   : > { %s446_s10 = scalar_lea.sflag [#allocation3], %s445_s7 }
 0x22e   : > { %p593_p8 = pnand %p599_p7, %p820_p6 }
 0x230   : > { %719 = dma.done.wait (!%p593_p8), %s446_s10, 128  }
 0x231   : > { %721 = vsyncadd (!%p593_p8), %s446_s10, 4294967168  ;;  %s455_s28 = scalar_lea.sflag [#allocation5], %s445_s7 }
 0x232   : > { %723 = dma.done.wait (!%p593_p8), %s455_s28, 128  }
 0x233   : > { %725 = vsyncadd (!%p593_p8), %s455_s28, 4294967168  ;;  %p19_p5 = scmp.ge.s32.totalorder %s803_s24, 4   ;;  %s933_s18 = smov %s732_s19 }
 0x234   : > { %s934_s19 = smov %s736_s20  ;;  %s935_s20 = smov %s814_s27 }
 0x235   : > { %s936_s21 = smov %s803_s24  ;;  %21 = sbr.rel (!%p19_p5) target bundleno = 5 (0x5), region = 102 }
 0x23c   :  { %467 = vsyncpa [#allocation3], 1 }
 0x23d   :  { %469 = vsyncpa [#allocation3 + $0x1], 1 }
 0x23e   :  { %470 = vsyncpa [#allocation5], 1 }
 0x23f   :  { %472 = vsyncpa [#allocation5 + $0x1], 1 }

</bundles_post_ra>
